<compile_context>
chip_gen: v7x
topology: tpu7x:2x2x1
jax: 0.10.0
libtpu: 0.0.40
codegen_flags: <defaults>
</compile_context>

<pallas_src>
import jax
import jax.numpy as jnp
from jax.experimental import pallas as pl
from jax.experimental.pallas import tpu as pltpu


def _round_up(a, b):
    return ((a + b - 1) // b) * b


def _cdiv(a, b):
    return -(-a // b)


def _block_spec(shape, index_map, buffers=None):
    """BlockSpec with an optional explicit buffer depth (pl.Buffered).

    Falls back to a plain BlockSpec if this JAX build does not support the
    `pipeline_mode` argument, so the kernel always compiles.
    """
    if buffers is not None and hasattr(pl, "Buffered"):
        try:
            return pl.BlockSpec(shape, index_map, pipeline_mode=pl.Buffered(buffers))
        except TypeError:
            pass
    return pl.BlockSpec(shape, index_map)


def _choose_tile_m(m, tm_max, min_steps=8):
    """Pick the M tile and grid length.

    Small problems get one full-extent block (block dim == array dim is always
    layout-legal).  Large problems get >= `min_steps` grid steps -- and an even
    step count when possible -- so each v7x TensorCore keeps a double-buffered
    pipeline (single-core v5e/v6e benefit from the same steady state).
    """
    tm_max = max(8, (tm_max // 8) * 8)
    if m <= 8 or (m <= tm_max and m < min_steps * 8):
        return m, 1
    tm = max(8, min(tm_max, _round_up(m, 8)))
    if _cdiv(m, tm) < min_steps:
        tm = max(8, _round_up(_cdiv(m, min_steps), 8))
    steps = _cdiv(m, tm)
    if steps > 1 and steps % 2:
        tm_even = max(8, _round_up(_cdiv(m, steps + 1), 8))
        if _cdiv(m, tm_even) % 2 == 0:
            tm, steps = tm_even, _cdiv(m, tm_even)
    return tm, steps


def _tile_vmem_bytes(rows, cols, itemsize):
    # VMEM tiles are padded to (8, 128) internally.
    return _round_up(max(rows, 1), 8) * _round_up(max(cols, 1), 128) * itemsize


def patch_embed_kernel(x_ref, w_ref, b_ref, o_ref):
    # x_ref: (tm, K_r) streamed tile; w_ref: (K_r, C_r) VMEM-resident weight;
    # b_ref: (1, C_r) f32 bias; o_ref: (tm, C_r) lane-dense output tile.
    acc = jnp.dot(x_ref[...], w_ref[...], preferred_element_type=jnp.float32)
    o_ref[...] = (acc + b_ref[...]).astype(o_ref.dtype)


def make_patch_embed(conv_w, conv_b, *, seq_len, patch_size, embed_dim,
                     num_nodes, x_dtype=jnp.float32, out_dtype=None, tm=1024):
    """Build (once) the folded weight / bias and return a jitted forward(x).

    conv_w: (E, D, patch_size, 1) PyTorch Conv2d weight; conv_b: (E,).
    forward: x (B, seq_len, num_nodes, D) -> (B, seq_len // patch_size,
    num_nodes, E).  x must already be in `x_dtype` (no wrapper-side cast).
    """
    p = int(patch_size)
    E = int(embed_dim)
    N = int(num_nodes)
    D = int(conv_w.shape[1])
    Lp = int(seq_len) // p              # Conv2d stride-p drops trailing steps
    assert conv_w.shape == (E, D, p, 1)
    x_dtype = jnp.dtype(x_dtype)
    out_dtype = jnp.dtype(x_dtype if out_dtype is None else out_dtype)

    Kp = p * N * D                      # contraction depth of one patch row
    NE = N * E                          # useful output columns per patch
    NE_pad = _round_up(NE, 128)         # lane-dense output -> unmasked vst

    # Fold r consecutive patches per GEMM row when Kp < 128 so the input tile
    # is not heavily lane-padded and HBM DMA rows stay long.  r must divide Lp
    # so the fold stays a free reshape for any batch size.
    r = 1
    if Kp < 128:
        for cand in range(min(_cdiv(128, Kp), Lp), 0, -1):
            if Lp % cand == 0:
                r = cand
                break
    K_r = r * Kp
    C_r = r * NE_pad

    # ---- weight / bias prep: done exactly once (hoisted out of forward) ----
    # TODO(synk): for very large N on v5e the N^2 block-diagonal inflation can
    # become MXU-bound; switch to a per-N grid axis with the compact (p*D, E)
    # weight in that regime.
    w_small = jnp.transpose(conv_w[..., 0], (2, 1, 0))            # (p, D, E)
    eye_n = jnp.eye(N, dtype=w_small.dtype)
    # w_blk[(q,n,d), (m,e)] = w_small[q,d,e] * (n == m)
    w_blk = jnp.einsum("qde,nm->qndme", w_small, eye_n).reshape(Kp, NE)
    b_row = jnp.tile(jnp.asarray(conv_b, jnp.float32), N)          # (NE,)
    if NE_pad != NE:
        w_blk = jnp.pad(w_blk, ((0, 0), (0, NE_pad - NE)))
        b_row = jnp.pad(b_row, (0, NE_pad - NE))
    if r > 1:
        eye_r = jnp.eye(r, dtype=w_blk.dtype)
        # w_fold[(j,q,n,d), (j',m,e)] = w_blk[(q,n,d),(m,e)] * (j == j')
        w_fold = jnp.einsum("kc,js->jksc", w_blk, eye_r).reshape(K_r, C_r)
        b_fold = jnp.tile(b_row, r).reshape(1, C_r)
    else:
        w_fold, b_fold = w_blk, b_row.reshape(1, C_r)
    w_fold = jax.device_put(w_fold.astype(x_dtype))
    b_fold = jax.device_put(b_fold)

    # ---- per-generation VMEM cap ------------------------------------------
    try:
        info = pltpu.get_tpu_info()
        vmem_physical = int(getattr(info, "vmem_capacity_bytes", 0)) or (64 << 20)
    except Exception:
        vmem_physical = 64 << 20        # conservative default (v7x-sized)
    vmem_cap = min(int(0.75 * vmem_physical), 100 << 20)

    x_itemsize = x_dtype.itemsize
    w_itemsize = x_dtype.itemsize
    o_itemsize = out_dtype.itemsize

    def forward(x):
        B, L, N_in, D_in = x.shape
        assert (N_in, D_in) == (N, D), "x trailing dims must match the conv weight"
        assert x.dtype == x_dtype, (
            f"pass x already in the compute dtype {x_dtype} (got {x.dtype}); "
            "no wrapper-side cast is performed")
        if L != Lp * p:
            # Matches Conv2d stride semantics (drops the tail); this slice
            # copies x, so prefer feeding L that is a multiple of patch_size.
            x = x[:, :Lp * p]
        M = B * Lp                       # total patches
        M_r = M // r                     # GEMM rows (r | Lp  =>  r | M)
        x2d = x.reshape(M_r, K_r)        # metadata-only reshape; x read once

        tm_eff, grid_m = _choose_tile_m(M_r, tm)

        # VMEM budget with real element sizes and per-stream buffer counts
        # (x: 3-deep, out: 2; weight/bias budgeted at 2 in case Buffered(1)
        # is unavailable in this build).
        def budget(t):
            return (3 * _tile_vmem_bytes(t, K_r, x_itemsize)
                    + 2 * _tile_vmem_bytes(t, C_r, o_itemsize)
                    + 2 * _tile_vmem_bytes(K_r, C_r, w_itemsize)
                    + 2 * _tile_vmem_bytes(1, C_r, 4))

        while budget(tm_eff) > vmem_cap and tm_eff > 8:
            tm_eff = max(8, ((tm_eff // 2) // 8) * 8)
            grid_m = _cdiv(M_r, tm_eff)
        vmem_limit = int(min(max(budget(tm_eff) + (2 << 20), 16 << 20), vmem_cap))

        x_buffers = 3 if grid_m >= 4 else None   # hide HBM latency jitter
        out2d = pl.pallas_call(
            patch_embed_kernel,
            out_shape=jax.ShapeDtypeStruct((M_r, C_r), out_dtype),
            grid_spec=pltpu.PrefetchScalarGridSpec(
                num_scalar_prefetch=0,
                grid=(grid_m,),
                in_specs=[
                    _block_spec((tm_eff, K_r), lambda i: (i, 0), buffers=x_buffers),
                    _block_spec((K_r, C_r), lambda i: (0, 0), buffers=1),
                    _block_spec((1, C_r), lambda i: (0, 0), buffers=1),
                ],
                out_specs=pl.BlockSpec((tm_eff, C_r), lambda i: (i, 0)),
            ),
            compiler_params=pltpu.CompilerParams(
                dimension_semantics=("parallel",),
                vmem_limit_bytes=vmem_limit,
            ),
        )(x2d, w_fold, b_fold)

        out = out2d.reshape(M, NE_pad)          # free: (M_r, r*NE_pad) -> (M, NE_pad)
        if NE_pad != NE:
            out = out[:, :NE]                   # only when N*E is not lane-aligned
        # TODO(synk): norm_layer defaults to None in the module; a non-None
        # LayerNorm would be fused into the kernel epilogue (not implemented).
        return out.reshape(B, Lp, N, E)

    return jax.jit(forward)


if __name__ == "__main__":
    # Small shapes consistent with the module's forward:
    # B=2, L=seq_len=24, N=4, D=in_chans=3, patch_size=3, embed_dim=32.
    B, L, N, D = 2, 24, 4, 3
    patch_size, embed_dim = 3, 32
    Lp = L // patch_size

    key = jax.random.PRNGKey(0)
    kx, kw, kb = jax.random.split(key, 3)
    x = jax.random.normal(kx, (B, L, N, D), dtype=jnp.float32)
    conv_w = jax.random.normal(kw, (embed_dim, D, patch_size, 1),
                               dtype=jnp.float32) * 0.1
    conv_b = jax.random.normal(kb, (embed_dim,), dtype=jnp.float32) * 0.1

    # Pure-JAX reference (same conv-as-GEMM math, f32).
    x_g = x.reshape(B, Lp, patch_size, N, D)
    ref = jnp.einsum("blqnd,edq->blne", x_g, conv_w[..., 0]) + conv_b

    # f32 path.
    fwd = make_patch_embed(conv_w, conv_b, seq_len=L, patch_size=patch_size,
                           embed_dim=embed_dim, num_nodes=N,
                           x_dtype=jnp.float32)
    out = jax.block_until_ready(fwd(x))
    assert out.shape == (B, Lp, N, embed_dim)
    assert jnp.allclose(out, ref, atol=1e-4, rtol=1e-4)

    # bf16 stream: the *producer* hands us bf16 x (no wrapper-side cast) and
    # the output dtype is an independent knob (bf16 output halves writeback).
    x_bf16 = x.astype(jnp.bfloat16)
    fwd_bf16 = make_patch_embed(conv_w, conv_b, seq_len=L,
                                patch_size=patch_size, embed_dim=embed_dim,
                                num_nodes=N, x_dtype=jnp.bfloat16,
                                out_dtype=jnp.bfloat16)
    out_bf16 = jax.block_until_ready(fwd_bf16(x_bf16))
    assert out_bf16.shape == (B, Lp, N, embed_dim)
    assert out_bf16.dtype == jnp.bfloat16
    assert jnp.allclose(out_bf16.astype(jnp.float32), ref, atol=2e-1, rtol=2e-1)

    print("KERNEL_OK")
</pallas_src>

<mosaic_0001>
module attributes {stable_mosaic.version = 11 : i64} {
  func.func @patch_embed_kernel(%arg0: i32, %arg1: memref<4x144xf32, #tpu.memory_space<vmem>>, %arg2: memref<144x512xf32, #tpu.memory_space<vmem>>, %arg3: memref<1x512xf32, #tpu.memory_space<vmem>>, %arg4: memref<4x512xf32, #tpu.memory_space<vmem>>) attributes {dimension_semantics = [#tpu.dimension_semantics<parallel>], iteration_bounds = array<i64: 1>, scalar_prefetch = 0 : i64, scratch_operands = 0 : i64, tpu.core_type = #tpu.core_type<tc>, window_params = [{transform_indices = @transform_0, window_bounds = array<i64: 4, 144>}, {pipeline_mode = #tpu.pipeline_mode<synchronous>, transform_indices = @transform_1, window_bounds = array<i64: 144, 512>}, {pipeline_mode = #tpu.pipeline_mode<synchronous>, transform_indices = @transform_2, window_bounds = array<i64: 1, 512>}, {transform_indices = @transform_3, window_bounds = array<i64: 4, 512>}]} {
    %c0 = arith.constant 0 : index
    %c0_0 = arith.constant 0 : index
    %0 = vector.load %arg1[%c0, %c0_0] : memref<4x144xf32, #tpu.memory_space<vmem>>, vector<4x144xf32>
    %c0_1 = arith.constant 0 : index
    %c0_2 = arith.constant 0 : index
    %1 = vector.load %arg2[%c0_1, %c0_2] : memref<144x512xf32, #tpu.memory_space<vmem>>, vector<144x512xf32>
    %cst = arith.constant dense<0.000000e+00> : vector<4x512xf32>
    %2 = tpu.matmul %0, %1, %cst {dimension_numbers = #tpu.dot_dimension_numbers<[1], [0], [0], [1], [0, 0, 1, 1], [], []>} : vector<4x144xf32>, vector<144x512xf32>, vector<4x512xf32> -> vector<4x512xf32>
    %c0_3 = arith.constant 0 : index
    %c0_4 = arith.constant 0 : index
    %3 = vector.load %arg3[%c0_3, %c0_4] : memref<1x512xf32, #tpu.memory_space<vmem>>, vector<1x512xf32>
    %4 = vector.broadcast %3 : vector<1x512xf32> to vector<4x512xf32>
    %5 = arith.addf %2, %4 : vector<4x512xf32>
    %c0_5 = arith.constant 0 : index
    %c0_6 = arith.constant 0 : index
    %6 = vector.load %arg4[%c0_5, %c0_6] : memref<4x512xf32, #tpu.memory_space<vmem>>, vector<4x512xf32>
    tpu.vector_store %arg4[%c0_5, %c0_6], %5 {strides = array<i32>} : memref<4x512xf32, #tpu.memory_space<vmem>>, vector<4x512xf32>,
    return
  }
  func.func @transform_0(%arg0: i32) -> (i32, i32) {
    %c0_i32 = arith.constant 0 : i32
    %c0_i32_0 = arith.constant 0 : i32
    return %arg0, %c0_i32 : i32, i32
  }
  func.func @transform_1(%arg0: i32) -> (i32, i32) {
    %c0_i32 = arith.constant 0 : i32
    %c0_i32_0 = arith.constant 0 : i32
    %c0_i32_1 = arith.constant 0 : i32
    return %c0_i32, %c0_i32_0 : i32, i32
  }
  func.func @transform_2(%arg0: i32) -> (i32, i32) {
    %c0_i32 = arith.constant 0 : i32
    %c0_i32_0 = arith.constant 0 : i32
    %c0_i32_1 = arith.constant 0 : i32
    return %c0_i32, %c0_i32_0 : i32, i32
  }
  func.func @transform_3(%arg0: i32) -> (i32, i32) {
    %c0_i32 = arith.constant 0 : i32
    %c0_i32_0 = arith.constant 0 : i32
    return %arg0, %c0_i32 : i32, i32
  }
}

</mosaic_0001>

<bundles_post_ra>
// kernel: forward.1
= control target key start
LH: loop header
LB: loop body
LE: loop exit
PB: predicated region body
PF: predicated region fallthrough
CT: control target
= control target key end

     0   :  { %8 = vsyncpa [#allocation3], 0  ;;  %s387_s12 = smov [#allocation2]   ;;  %s436_s0 = inlined_call_operand.vmem [shape: f32[4,144], index: 0, kind: input, shape index: {}]   ;;  %s437_s1 = inlined_call_operand.hbm [shape: f32[144,512], index: 1, kind: input, shape index: {}]   ;;  %s438_s2 = inlined_call_operand.vmem [shape: f32[1,512], index: 2, kind: input, shape index: {}]   ;;  %s439_s3 = inlined_call_operand.vmem [shape: f32[4,512], index: 3, kind: output, shape index: {}]  }
   0x1   :  { %s16_s13 = sshll.u32 %s387_s12, 4  ;;  %s363_s16 = scalar_lea.hbm %s437_s1, 9216  ;;  %s17_s13 = int_to_ptr.vmem [resolvable:$true] %s16_s13 }
   0x2   :  { %p364_p0 = scmp.ne.s32.totalorder %s437_s1, %s363_s16  ;;  %p367_p1 = scmp.lt.u32.totalorder %s363_s16, %s437_s1 }
   0x4   :  { %p369_p2 = pnand %p367_p1, %p364_p0 }
   0x6   :  { %372 = shalt.err (!%p369_p2)
}
   0x7   :  { %s373_s21 = scalar_lea.vmem %s17_s13, 9216  ;;  %p378_p4 = scmp.lt.s32.totalorder %s17_s13, %s17_s13 }
   0x8   :  { %p374_p3 = scmp.ne.s32.totalorder %s17_s13, %s373_s21  ;;  %p379_p5 = scmp.lt.s32.totalorder %s373_s21, %s373_s21 }
   0xa   :  { %p380_p6 = por %p379_p5, %p378_p4 }
   0xc   :  { %p381_p7 = pnand %p380_p6, %p374_p3 }
   0xe   :  { %384 = shalt.err (!%p381_p7)
}
   0xf   :  { %s388_s22 = smov 512   ;;  %s389_s23 = smov 32  }
  0x10   :  { %22 = dma.hbm_to_vmem [thread:$0]  %s437_s1, 9216, %s17_s13, [#allocation3], %s388_s22, %s388_s22, %s389_s23  }
  0x11   :  { %385 = dma.done.wait [#allocation3], 9216  }
  0x12   :  { %386 = vsyncadd [#allocation3], 4294958080  ;;  %v30_v0 = vld [vmem:[#allocation2 + $0x8] sm:$0xff]  ;;  %v32_v2 = vld [vmem:[#allocation2 + $0x18] sm:$0xff]  ;;  %vm125_vm0 = vcmask 130048  }
  0x13   :  { %v34_v1 = vld [vmem:[#allocation2 + $0x28] sm:$0xff]  ;;  %v36_v4 = vld [vmem:[#allocation2 + $0x38] sm:$0xff]  ;;  %v29_v5 = vld [vmem:[#allocation2] sm:$0xff] }
  0x14   :  { %v287_v3 = vpack.c.bf16 %v34_v1, %v30_v0  ;;  %v33_v6 = vld [vmem:[#allocation2 + $0x20] sm:$0xff]  ;;  %v323_v7 = vpack.c.bf16 %v36_v4, %v32_v2  ;;  %v31_v9 = vld [vmem:[#allocation2 + $0x10] sm:$0xff]  ;;  %v38_v11 = vld [vmem:[#allocation2 + $0x48] sm:$0xff] }
  0x15   :  { %v289_v8 = vpack.c.bf16 %v33_v6, %v29_v5  ;;  %v35_v10 = vld [vmem:[#allocation2 + $0x30] sm:$0xff]  ;;  %v42_v13 = vld [vmem:[#allocation2 + $0x68] sm:$0xff]  ;;  %v40_v14 = vld [vmem:[#allocation2 + $0x58] sm:$0xff] }
  0x16   :  { %288 = vmatprep.subr.bf16.mxu0 %v287_v3  ;;  %v325_v12 = vpack.c.bf16 %v35_v10, %v31_v9  ;;  %v44_v15 = vld [vmem:[#allocation2 + $0x78] sm:$0xff]  ;;  %324 = vmatprep.subr.bf16.mxu1 %v323_v7  ;;  %v291_v16 = vpack.c.bf16 %v42_v13, %v38_v11  ;;  %v37_v18 = vld [vmem:[#allocation2 + $0x40] sm:$0xff]  ;;  %v39_v20 = vld [vmem:[#allocation2 + $0x50] sm:$0xff] }
  0x17   :  { %290 = vmatpush1.bf16.msra.mxu0 %v289_v8  ;;  %v327_v17 = vpack.c.bf16 %v44_v15, %v40_v14  ;;  %v41_v19 = vld [vmem:[#allocation2 + $0x60] sm:$0xff]  ;;  %v43_v22 = vld [vmem:[#allocation2 + $0x70] sm:$0xff]  ;;  %v46_v23 = vld [vmem:[#allocation2 + $0x88] sm:$0xff] }
  0x18   :  { %326 = vmatpush1.bf16.msra.mxu1 %v325_v12  ;;  %v293_v21 = vpack.c.bf16 %v41_v19, %v37_v18  ;;  %v50_v24 = vld [vmem:[#allocation2 + $0xa8] sm:$0xff]  ;;  %292 = vmatprep.subr.bf16.mxu0 %v291_v16  ;;  %v329_v25 = vpack.c.bf16 %v43_v22, %v39_v20  ;;  %v48_v27 = vld [vmem:[#allocation2 + $0x98] sm:$0xff]  ;;  %v45_v29 = vld [vmem:[#allocation2 + $0x80] sm:$0xff] }
  0x19   :  { %328 = vmatprep.subr.bf16.mxu1 %v327_v17  ;;  %v295_v26 = vpack.c.bf16 %v50_v24, %v46_v23  ;;  %v52_v28 = vld [vmem:[#allocation2 + $0xb8] sm:$0xff]  ;;  %v49_v31 = vld [vmem:[#allocation2 + $0xa0] sm:$0xff]  ;;  %v47_v32 = vld [vmem:[#allocation2 + $0x90] sm:$0xff] }
  0x1a   :  { %v331_v30 = vpack.c.bf16 %v52_v28, %v48_v27  ;;  %v51_v33 = vld [vmem:[#allocation2 + $0xb0] sm:$0xff]  ;;  %v297_v34 = vpack.c.bf16 %v49_v31, %v45_v29  ;;  %v54_v35 = vld [vmem:[#allocation2 + $0xc8] sm:$0xff]  ;;  %v56_v37 = vld [vmem:[#allocation2 + $0xd8] sm:$0xff] }
  0x1b   :  { %294 = vmatpush1.bf16.msra.mxu0 %v293_v21  ;;  %v58_v36 = vld [vmem:[#allocation2 + $0xe8] sm:$0xff]  ;;  %v333_v38 = vpack.c.bf16 %v51_v33, %v47_v32  ;;  %v60_v40 = vld [vmem:[#allocation2 + $0xf8] sm:$0xff]  ;;  %v53_v41 = vld [vmem:[#allocation2 + $0xc0] sm:$0xff] }
  0x1c   :  { %330 = vmatpush1.bf16.msra.mxu1 %v329_v25  ;;  %296 = vmatprep.subr.bf16.mxu0 %v295_v26  ;;  %v299_v39 = vpack.c.bf16 %v58_v36, %v54_v35  ;;  %v57_v42 = vld [vmem:[#allocation2 + $0xe0] sm:$0xff]  ;;  %v335_v43 = vpack.c.bf16 %v60_v40, %v56_v37  ;;  %v55_v44 = vld [vmem:[#allocation2 + $0xd0] sm:$0xff]  ;;  %v62_v46 = vld [vmem:[#allocation2 + $0x108] sm:$0xff] }
  0x1d   :  { %332 = vmatprep.subr.bf16.mxu1 %v331_v30  ;;  %v59_v45 = vld [vmem:[#allocation2 + $0xf0] sm:$0xff]  ;;  %v66_v47 = vld [vmem:[#allocation2 + $0x128] sm:$0xff]  ;;  %v64_v48 = vld [vmem:[#allocation2 + $0x118] sm:$0xff]  ;;  %v301_v50 = vpack.c.bf16 %v57_v42, %v53_v41 }
  0x1e   :  { %v68_v49 = vld [vmem:[#allocation2 + $0x138] sm:$0xff]  ;;  %v337_v51 = vpack.c.bf16 %v59_v45, %v55_v44  ;;  %v303_v52 = vpack.c.bf16 %v66_v47, %v62_v46  ;;  %v61_v53 = vld [vmem:[#allocation2 + $0x100] sm:$0xff]  ;;  %v63_v55 = vld [vmem:[#allocation2 + $0x110] sm:$0xff]  ;;  %v103_v46 = vlaneseq }
  0x1f   :  { %298 = vmatpush1.bf16.msra.mxu0 %v297_v34  ;;  %v65_v54 = vld [vmem:[#allocation2 + $0x120] sm:$0xff]  ;;  %v339_v56 = vpack.c.bf16 %v68_v49, %v64_v48  ;;  %v67_v57 = vld [vmem:[#allocation2 + $0x130] sm:$0xff]  ;;  %v70_v58 = vld [vmem:[#allocation2 + $0x148] sm:$0xff] }
  0x20   :  { %334 = vmatpush1.bf16.msra.mxu1 %v333_v38  ;;  %300 = vmatprep.subr.bf16.mxu0 %v299_v39  ;;  %v74_v59 = vld [vmem:[#allocation2 + $0x168] sm:$0xff]  ;;  %v72_v60 = vld [vmem:[#allocation2 + $0x158] sm:$0xff]  ;;  %v305_v62 = vpack.c.bf16 %v65_v54, %v61_v53  ;;  %v341_v63 = vpack.c.bf16 %v67_v57, %v63_v55  ;;  %v69_v1 = vld [vmem:[#allocation2 + $0x140] sm:$0xff]  ;;  %v104_v47 = vshrl.u32 %v103_v46, 7 }
  0x21   :  { %336 = vmatprep.subr.bf16.mxu1 %v335_v43  ;;  %v76_v61 = vld [vmem:[#allocation2 + $0x178] sm:$0xff]  ;;  %v307_v0 = vpack.c.bf16 %v74_v59, %v70_v58  ;;  %v73_v2 = vld [vmem:[#allocation2 + $0x160] sm:$0xff]  ;;  %v71_v3 = vld [vmem:[#allocation2 + $0x150] sm:$0xff] }
  0x22   :  { %v343_v4 = vpack.c.bf16 %v76_v61, %v72_v60  ;;  %v75_v5 = vld [vmem:[#allocation2 + $0x170] sm:$0xff]  ;;  %v78_v6 = vld [vmem:[#allocation2 + $0x188] sm:$0xff]  ;;  %v80_v8 = vld [vmem:[#allocation2 + $0x198] sm:$0xff]  ;;  %v309_v10 = vpack.c.bf16 %v73_v2, %v69_v1  ;;  %v105_v48 = vsub.s32 0, %v104_v47 }
  0x23   :  { %302 = vmatpush1.bf16.msra.mxu0 %v301_v50  ;;  %v82_v7 = vld [vmem:[#allocation2 + $0x1a8] sm:$0xff]  ;;  %v84_v9 = vld [vmem:[#allocation2 + $0x1b8] sm:$0xff]  ;;  %v345_v11 = vpack.c.bf16 %v75_v5, %v71_v3  ;;  %v77_v13 = vld [vmem:[#allocation2 + $0x180] sm:$0xff]  ;;  %v113_v50 = vsub.s32 2, %v104_v47 }
  0x24   :  { %338 = vmatpush1.bf16.msra.mxu1 %v337_v51  ;;  %304 = vmatprep.subr.bf16.mxu0 %v303_v52  ;;  %v311_v12 = vpack.c.bf16 %v82_v7, %v78_v6  ;;  %v81_v14 = vld [vmem:[#allocation2 + $0x1a0] sm:$0xff]  ;;  %v79_v15 = vld [vmem:[#allocation2 + $0x190] sm:$0xff]  ;;  %v347_v16 = vpack.c.bf16 %v84_v9, %v80_v8  ;;  %v86_v18 = vld [vmem:[#allocation2 + $0x1c8] sm:$0xff]  ;;  %v109_v51 = vsub.s32 1, %v104_v47  ;;  %v117_v52 = vsub.s32 3, %v104_v47 }
  0x25   :  { %340 = vmatprep.subr.bf16.mxu1 %v339_v56  ;;  %v83_v17 = vld [vmem:[#allocation2 + $0x1b0] sm:$0xff]  ;;  %v90_v19 = vld [vmem:[#allocation2 + $0x1e8] sm:$0xff]  ;;  %v88_v20 = vld [vmem:[#allocation2 + $0x1d8] sm:$0xff]  ;;  %v313_v22 = vpack.c.bf16 %v81_v14, %v77_v13 }
  0x26   :  { %v92_v21 = vld [vmem:[#allocation2 + $0x1f8] sm:$0xff]  ;;  %v28_v23 = vld [vmem:[%s436_s0] sm:$0xff]  ;;  %v349_v24 = vpack.c.bf16 %v83_v17, %v79_v15  ;;  %v315_v25 = vpack.c.bf16 %v90_v19, %v86_v18  ;;  %v87_v28 = vld [vmem:[#allocation2 + $0x1d0] sm:$0xff] }
  0x27   :  { %306 = vmatpush1.bf16.msra.mxu0 %v305_v62  ;;  %v85_v26 = vld [vmem:[#allocation2 + $0x1c0] sm:$0xff]  ;;  %v124_v29 = vcombine.high %v28_v23, %v28_v23  ;;  %v351_v30 = vpack.c.bf16 %v92_v21, %v88_v20  ;;  %v91_v31 = vld [vmem:[#allocation2 + $0x1f0] sm:$0xff]  ;;  %v94_v32 = vld [vmem:[#allocation2 + $0x208] sm:$0xff] }
  0x28   :  { %342 = vmatpush1.bf16.msra.mxu1 %v341_v63  ;;  %308 = vmatprep.subr.bf16.mxu0 %v307_v0  ;;  %v89_v27 = vld [vmem:[#allocation2 + $0x1e0] sm:$0xff]  ;;  %v98_v33 = vld [vmem:[#allocation2 + $0x228] sm:$0xff]  ;;  %v96_v34 = vld [vmem:[#allocation2 + $0x218] sm:$0xff]  ;;  %v353_v37 = vpack.c.bf16 %v91_v31, %v87_v28 }
  0x29   :  { %344 = vmatprep.subr.bf16.mxu1 %v343_v4  ;;  %v100_v35 = vld [vmem:[#allocation2 + $0x238] sm:$0xff]  ;;  %285 = vmatprep.mubr.msk.f32.mxu0 %vm125_vm0, %v124_v29  ;;  %v317_v36 = vpack.c.bf16 %v89_v27, %v85_v26  ;;  %v319_v38 = vpack.c.bf16 %v98_v33, %v94_v32  ;;  %v93_v39 = vld [vmem:[#allocation2 + $0x200] sm:$0xff]  ;;  %v95_v42 = vld [vmem:[#allocation2 + $0x210] sm:$0xff] }
  0x2a   :  { %286 = vmatprep.mubr.msk.f32.mxu1 %vm125_vm0, %v124_v29  ;;  %v97_v40 = vld [vmem:[#allocation2 + $0x220] sm:$0xff]  ;;  %v355_v41 = vpack.c.bf16 %v100_v35, %v96_v34  ;;  %v99_v43 = vld [vmem:[#allocation2 + $0x230] sm:$0xff] }
  0x2b   :  { %310 = vmatpush1.bf16.msra.mxu0 %v309_v10  ;;  %v321_v44 = vpack.c.bf16 %v97_v40, %v93_v39  ;;  %v357_v45 = vpack.c.bf16 %v99_v43, %v95_v42  ;;  %v101_v49 = vld [vmem:[%s438_s2] sm:$0xf] }
  0x2c   :  { %346 = vmatpush1.bf16.msra.mxu1 %v345_v11  ;;  %312 = vmatprep.subr.bf16.mxu0 %v311_v12  ;;  %v106_v53 = vrot.slane %v101_v49, %v105_v48  ;;  %v114_v54 = vrot.slane %v101_v49, %v113_v50  ;;  %v110_v55 = vrot.slane %v101_v49, %v109_v51 }
  0x2d   :  { %348 = vmatprep.subr.bf16.mxu1 %v347_v16  ;;  %v118_v56 = vrot.slane %v101_v49, %v117_v52 }
  0x2f   :  { %314 = vmatpush1.bf16.msra.mxu0 %v313_v22 }
  0x30   :  { %350 = vmatpush1.bf16.msra.mxu1 %v349_v24  ;;  %316 = vmatprep.subr.bf16.mxu0 %v315_v25 }
  0x31   :  { %352 = vmatprep.subr.bf16.mxu1 %v351_v30 }
  0x33   :  { %318 = vmatpush1.bf16.msra.mxu0 %v317_v36 }
  0x34   :  { %354 = vmatpush1.bf16.msra.mxu1 %v353_v37  ;;  %320 = vmatprep.subr.bf16.mxu0 %v319_v38 }
  0x35   :  { %356 = vmatprep.subr.bf16.mxu1 %v355_v41 }
  0x37   :  { %322 = vmatpush1.bf16.msra.mxu0 %v321_v44 }
  0x38   :  { %358 = vmatpush1.bf16.msra.mxu1 %v357_v45 }
  0x3a   :  { %193 = vmatmul.mubr.f32.vlgmr.msra.gmra.mrb[0].mxu0 %v28_v23 }
  0x3b   :  { %264 = vmatmul.mubr.f32.vlgmr.msra.gmra.mrb[0].mxu1 %v28_v23 }
 0x10d   :  { %v194_v57 = vpop.f32.mrb[0].mxu0 }
 0x10e   :  { %v195_v58 = vadd.f32 %v194_v57, %v106_v53  ;;  %v265_v59 = vpop.f32.mrb[0].mxu1  ;;  %v196_v60 = vpop.f32.mrb[1].mxu0 }
 0x10f   :  { %v266_v61 = vadd.f32 %v265_v59, %v114_v54  ;;  %v197_v62 = vadd.f32 %v196_v60, %v110_v55  ;;  %v267_v63 = vpop.f32.mrb[1].mxu1 }
 0x110   :  { %v268_v0 = vadd.f32 %v267_v63, %v118_v56 }
 0x111   :  { %v274_v1 = vcombine.low %v195_v58, %v197_v62 }
 0x112   :  { %v275_v2 = vcombine.low %v266_v61, %v268_v0 }
 0x113   :  { %278 = vst [vmem:[%s439_s3] sm:$0xff] %v274_v1 }
 0x114   :  { %279 = vst [vmem:[%s439_s3 + $0x8] sm:$0xff] %v275_v2 }
 0x115   :  { %284 = vsyncpa [#allocation3], 1 }

</bundles_post_ra>
